<compile_context>
chip_gen: v7x
topology: tpu7x:2x2x1
jax: 0.10.0
libtpu: 0.0.40
codegen_flags: <defaults>
</compile_context>

<pallas_src>
import functools
import math

import jax
import jax.numpy as jnp
import numpy as np
from jax import lax
from jax.experimental import pallas as pl
from jax.experimental.pallas import tpu as pltpu

_VMEM_LIMIT = 64 * 1024 * 1024  # explicit scoped-VMEM cap (safe on v5e/v6e/v7x)


def _pick_tile(dim, preferred, align):
    """Largest tile <= `preferred` that divides `dim` and is a multiple of `align`.
    Falls back to the full dim (which always satisfies the (8,128) block rule)."""
    if dim <= preferred:
        return dim
    t = (preferred // align) * align
    while t >= align:
        if dim % t == 0:
            return t
        t -= align
    return dim


# ---------------------------------------------------------------------------
# Tiled linear:  y = x @ w.T + b   (torch nn.Linear semantics, w is (N, K))
# ---------------------------------------------------------------------------
def _linear_kernel(x_ref, w_ref, b_ref, o_ref, acc_ref):
    k = pl.program_id(2)

    @pl.when(k == 0)
    def _init():
        acc_ref[...] = jnp.zeros(acc_ref.shape, acc_ref.dtype)

    # Contract last dims of both operands -> feeds the MXU directly,
    # no XLU transpose of the weight tile.
    acc_ref[...] += lax.dot_general(
        x_ref[...], w_ref[...],
        dimension_numbers=(((1,), (1,)), ((), ())),
        preferred_element_type=jnp.float32)

    @pl.when(k == pl.num_programs(2) - 1)
    def _finalize():
        o_ref[...] = (acc_ref[...] + b_ref[...]).astype(o_ref.dtype)


def pallas_linear(x, w, b, *, tm=256, tn=256, tk=256):
    """y = x @ w.T + b with an f32 VMEM accumulator and a pipelined (M,N,K) grid."""
    M, K = x.shape
    N = w.shape[0]
    tm = _pick_tile(M, tm, 8)
    tn = _pick_tile(N, tn, 128)
    tk = _pick_tile(K, tk, 128)
    grid = (M // tm, N // tn, K // tk)

    bytes_per = jnp.dtype(x.dtype).itemsize
    cost = pl.CostEstimate(
        flops=2 * M * N * K,
        transcendentals=0,
        bytes_accessed=(M * K + N * K + M * N + N) * bytes_per)

    return pl.pallas_call(
        _linear_kernel,
        out_shape=jax.ShapeDtypeStruct((M, N), x.dtype),
        grid=grid,
        in_specs=[
            pl.BlockSpec((tm, tk), lambda i, j, k: (i, k)),
            pl.BlockSpec((tn, tk), lambda i, j, k: (j, k)),
            pl.BlockSpec((1, tn), lambda i, j, k: (0, j)),
        ],
        out_specs=pl.BlockSpec((tm, tn), lambda i, j, k: (i, j)),
        scratch_shapes=[pltpu.VMEM((tm, tn), jnp.float32)],
        compiler_params=pltpu.CompilerParams(
            dimension_semantics=("parallel", "parallel", "arbitrary"),
            vmem_limit_bytes=_VMEM_LIMIT),
        cost_estimate=cost,
    )(x, w, b.reshape(1, N))


# ---------------------------------------------------------------------------
# Causal flash attention:  softmax(q k^T / sqrt(D), causal) @ v,  q/k/v (B,H,T,D)
# ---------------------------------------------------------------------------
def _flash_attn_kernel(q_ref, k_ref, v_ref, o_ref, m_ref, l_ref, acc_ref,
                       *, block_t):
    qi = pl.program_id(2)
    kv = pl.program_id(3)

    @pl.when(kv == 0)
    def _init():
        m_ref[...] = jnp.full(m_ref.shape, -jnp.inf, m_ref.dtype)
        l_ref[...] = jnp.zeros(l_ref.shape, l_ref.dtype)
        acc_ref[...] = jnp.zeros(acc_ref.shape, acc_ref.dtype)

    def _block(masked):
        q = q_ref[0, 0]          # (tq, D); pre-scaled by 1/sqrt(D); no forced upcast
        k = k_ref[0, 0]          # (tk, D)
        v = v_ref[0, 0]          # (tk, D)
        # QK^T via contraction on the last dims (no in-kernel transpose).
        s = lax.dot_general(q, k, dimension_numbers=(((1,), (1,)), ((), ())),
                            preferred_element_type=jnp.float32)  # (tq, tk) f32
        if masked:  # only the diagonal block needs the causal mask
            row = qi * block_t + lax.broadcasted_iota(jnp.int32, s.shape, 0)
            col = kv * block_t + lax.broadcasted_iota(jnp.int32, s.shape, 1)
            s = jnp.where(col <= row, s, jnp.float32(-1e30))
        m_prev = m_ref[...]
        m_new = jnp.maximum(m_prev, jnp.max(s, axis=-1, keepdims=True))
        alpha = jnp.exp(m_prev - m_new)
        p = jnp.exp(s - m_new)
        l_ref[...] = alpha * l_ref[...] + jnp.sum(p, axis=-1, keepdims=True)
        acc_ref[...] = alpha * acc_ref[...] + jnp.dot(
            p.astype(v.dtype), v, preferred_element_type=jnp.float32)
        m_ref[...] = m_new

    # Causality (tq == tk): blocks above the diagonal (kv > qi) are skipped entirely;
    # strictly-below-diagonal blocks need no mask; only the diagonal block is masked.
    @pl.when(kv < qi)
    def _full():
        _block(masked=False)

    @pl.when(kv == qi)
    def _diag():
        _block(masked=True)

    @pl.when(kv == pl.num_programs(3) - 1)
    def _finalize():
        # Divide happens once per q block (not in the inner loop).  approx=False keeps
        # the strict 1e-5 check below; flip to approx=True (EUP slot) in production.
        inv_l = pl.reciprocal(l_ref[...], approx=False)
        o_ref[...] = (acc_ref[...] * inv_l)[None, None].astype(o_ref.dtype)


def pallas_causal_attention(q, k, v, *, block_t=128):
    """scaled_dot_product_attention(q, k, v, is_causal=True); q,k,v: (B, H, T, D)."""
    B, H, T, D = q.shape
    bt = _pick_tile(T, block_t, 8)
    nq = T // bt
    grid = (B, H, nq, nq)

    # Scale q once here (fuses with the wrapper-side head transpose in XLA)
    # instead of a per-block TxT VPU multiply inside the kernel.
    q = q * jnp.asarray(1.0 / math.sqrt(D), dtype=q.dtype)

    qo_spec = pl.BlockSpec((1, 1, bt, D), lambda b, h, i, j: (b, h, i, 0))
    # Clamp the kv block index to the diagonal: above-diagonal blocks are never
    # computed, so this also avoids fetching them from HBM (block index unchanged).
    kv_spec = pl.BlockSpec((1, 1, bt, D),
                           lambda b, h, i, j: (b, h, jnp.minimum(j, i), 0))

    bytes_per = jnp.dtype(q.dtype).itemsize
    cost = pl.CostEstimate(
        flops=2 * B * H * T * T * D,              # qk^T + pv, causal ~ half of dense
        transcendentals=B * H * T * T // 2,
        bytes_accessed=4 * B * H * T * D * bytes_per)

    kernel = functools.partial(_flash_attn_kernel, block_t=bt)
    return pl.pallas_call(
        kernel,
        out_shape=jax.ShapeDtypeStruct((B, H, T, D), q.dtype),
        grid=grid,
        in_specs=[qo_spec, kv_spec, kv_spec],
        out_specs=qo_spec,
        scratch_shapes=[
            pltpu.VMEM((bt, 1), jnp.float32),   # running row max m
            pltpu.VMEM((bt, 1), jnp.float32),   # running denominator l
            pltpu.VMEM((bt, D), jnp.float32),   # output accumulator
        ],
        compiler_params=pltpu.CompilerParams(
            dimension_semantics=("parallel", "parallel", "parallel", "arbitrary"),
            vmem_limit_bytes=_VMEM_LIMIT),
        cost_estimate=cost,
    )(q, k, v)


# ---------------------------------------------------------------------------
# CausalSelfAttention forward (glue in plain JAX, hot paths in Pallas)
# ---------------------------------------------------------------------------
def causal_self_attention(x, params, n_head, *, linear_block=256, attn_block=128):
    B, T, C = x.shape
    hd = C // n_head

    qkv = pallas_linear(x.reshape(B * T, C), params["w_attn"], params["b_attn"],
                        tm=linear_block, tn=linear_block, tk=linear_block)
    qkv = qkv.reshape(B, T, 3 * C)
    q, k, v = jnp.split(qkv, 3, axis=2)

    # TODO(synk): head split/merge stays in XLA (the transpose fuses with the q
    # scaling); folding it into the attention BlockSpecs needs head_dim-granular
    # last-dim blocks, which violates the (8,128) block rule for head_dim < 128.
    def to_heads(t):  # (B, T, C) -> (B, H, T, hd)
        return t.reshape(B, T, n_head, hd).transpose(0, 2, 1, 3)

    y = pallas_causal_attention(to_heads(q), to_heads(k), to_heads(v),
                                block_t=attn_block)            # (B, H, T, hd)
    y = y.transpose(0, 2, 1, 3).reshape(B * T, C)              # merge heads
    y = pallas_linear(y, params["w_proj"], params["b_proj"],
                      tm=linear_block, tn=linear_block, tk=linear_block)
    return y.reshape(B, T, C)


# pure-JAX reference for a sanity check
def reference(x, params, n_head):
    B, T, C = x.shape
    hd = C // n_head
    qkv = x @ params["w_attn"].T + params["b_attn"]
    q, k, v = jnp.split(qkv, 3, axis=2)

    def to_heads(t):
        return t.reshape(B, T, n_head, hd).transpose(0, 2, 1, 3)

    q, k, v = to_heads(q), to_heads(k), to_heads(v)
    s = jnp.einsum("bhqd,bhkd->bhqk", q, k) / math.sqrt(hd)
    mask = jnp.tril(jnp.ones((T, T), dtype=bool))
    s = jnp.where(mask[None, None], s, -jnp.inf)
    p = jax.nn.softmax(s, axis=-1)
    y = jnp.einsum("bhqk,bhkd->bhqd", p, v)
    y = y.transpose(0, 2, 1, 3).reshape(B, T, C)
    return y @ params["w_proj"].T + params["b_proj"]


if __name__ == "__main__":
    # Small config consistent with the module: n_embd divisible by n_head, T <= block_size.
    # Chosen so both kernels exercise multi-block grids (M/N/K tiling, K-accumulation,
    # diagonal-masked / unmasked / skipped attention blocks, multi-step online softmax).
    B, T, C, n_head = 2, 128, 256, 4   # head_dim = 64

    key = jax.random.PRNGKey(0)
    kx, k1, k2, k3, k4 = jax.random.split(key, 5)

    bound = 1.0 / math.sqrt(C)
    params = {
        "w_attn": jax.random.uniform(k1, (3 * C, C), jnp.float32, -bound, bound),
        "b_attn": jax.random.uniform(k2, (3 * C,), jnp.float32, -bound, bound),
        "w_proj": jax.random.uniform(k3, (C, C), jnp.float32, -bound, bound),
        "b_proj": jax.random.uniform(k4, (C,), jnp.float32, -bound, bound),
    }
    x = jax.random.normal(kx, (B, T, C), jnp.float32)

    out = causal_self_attention(x, params, n_head, linear_block=128, attn_block=64)
    out = jax.block_until_ready(out)

    ref = reference(x, params, n_head)
    np.testing.assert_allclose(np.asarray(out), np.asarray(ref), rtol=2e-5, atol=2e-5)

    print("KERNEL_OK")
</pallas_src>

<mosaic_0001>
module attributes {stable_mosaic.version = 11 : i64} {
  func.func @_linear_kernel(%arg0: i32, %arg1: i32, %arg2: i32, %arg3: memref<128x128xf32, #tpu.memory_space<vmem>>, %arg4: memref<128x128xf32, #tpu.memory_space<vmem>>, %arg5: memref<1x128xf32, #tpu.memory_space<vmem>>, %arg6: memref<128x128xf32, #tpu.memory_space<vmem>>, %arg7: memref<128x128xf32, #tpu.memory_space<vmem>>) attributes {dimension_semantics = [#tpu.dimension_semantics<parallel>, #tpu.dimension_semantics<parallel>, #tpu.dimension_semantics<arbitrary>], iteration_bounds = array<i64: 2, 6, 2>, scalar_prefetch = 0 : i64, scratch_operands = 1 : i64, tpu.core_type = #tpu.core_type<tc>, window_params = [{transform_indices = @transform_0, window_bounds = array<i64: 128, 128>}, {transform_indices = @transform_1, window_bounds = array<i64: 128, 128>}, {transform_indices = @transform_2, window_bounds = array<i64: 1, 128>}, {transform_indices = @transform_3, window_bounds = array<i64: 128, 128>}]} {
    %c0_i32 = arith.constant 0 : i32
    %0 = arith.cmpi eq, %arg2, %c0_i32 : i32
    %1 = arith.extui %0 : i1 to i32
    %c0_i32_0 = arith.constant 0 : i32
    %2 = arith.cmpi ne, %1, %c0_i32_0 : i32
    scf.if %2 {
      %cst_9 = arith.constant 0.000000e+00 : f32
      %12 = vector.broadcast %cst_9 : f32 to vector<128x128xf32>
      %c0_10 = arith.constant 0 : index
      %c0_11 = arith.constant 0 : index
      %13 = vector.load %arg7[%c0_10, %c0_11] : memref<128x128xf32, #tpu.memory_space<vmem>>, vector<128x128xf32>
      tpu.vector_store %arg7[%c0_10, %c0_11], %12 {strides = array<i32>} : memref<128x128xf32, #tpu.memory_space<vmem>>, vector<128x128xf32>,
    } else {
    }
    %c0 = arith.constant 0 : index
    %c0_1 = arith.constant 0 : index
    %3 = vector.load %arg7[%c0, %c0_1] : memref<128x128xf32, #tpu.memory_space<vmem>>, vector<128x128xf32>
    %c0_2 = arith.constant 0 : index
    %c0_3 = arith.constant 0 : index
    %4 = vector.load %arg3[%c0_2, %c0_3] : memref<128x128xf32, #tpu.memory_space<vmem>>, vector<128x128xf32>
    %c0_4 = arith.constant 0 : index
    %c0_5 = arith.constant 0 : index
    %5 = vector.load %arg4[%c0_4, %c0_5] : memref<128x128xf32, #tpu.memory_space<vmem>>, vector<128x128xf32>
    %cst = arith.constant dense<0.000000e+00> : vector<128x128xf32>
    %6 = tpu.matmul %4, %5, %cst {dimension_numbers = #tpu.dot_dimension_numbers<[1], [1], [0], [0], [0, 0, 1, 0], [], []>} : vector<128x128xf32>, vector<128x128xf32>, vector<128x128xf32> -> vector<128x128xf32>
    %7 = arith.addf %3, %6 : vector<128x128xf32>
    %c0_6 = arith.constant 0 : index
    %c0_7 = arith.constant 0 : index
    %8 = vector.load %arg7[%c0_6, %c0_7] : memref<128x128xf32, #tpu.memory_space<vmem>>, vector<128x128xf32>
    tpu.vector_store %arg7[%c0_6, %c0_7], %7 {strides = array<i32>} : memref<128x128xf32, #tpu.memory_space<vmem>>, vector<128x128xf32>,
    %c1_i32 = arith.constant 1 : i32
    %9 = arith.cmpi eq, %arg2, %c1_i32 : i32
    %10 = arith.extui %9 : i1 to i32
    %c0_i32_8 = arith.constant 0 : i32
    %11 = arith.cmpi ne, %10, %c0_i32_8 : i32
    scf.if %11 {
      %c0_9 = arith.constant 0 : index
      %c0_10 = arith.constant 0 : index
      %12 = vector.load %arg7[%c0_9, %c0_10] : memref<128x128xf32, #tpu.memory_space<vmem>>, vector<128x128xf32>
      %c0_11 = arith.constant 0 : index
      %c0_12 = arith.constant 0 : index
      %13 = vector.load %arg5[%c0_11, %c0_12] : memref<1x128xf32, #tpu.memory_space<vmem>>, vector<1x128xf32>
      %14 = vector.broadcast %13 : vector<1x128xf32> to vector<128x128xf32>
      %15 = arith.addf %12, %14 : vector<128x128xf32>
      %c0_13 = arith.constant 0 : index
      %c0_14 = arith.constant 0 : index
      %16 = vector.load %arg6[%c0_13, %c0_14] : memref<128x128xf32, #tpu.memory_space<vmem>>, vector<128x128xf32>
      tpu.vector_store %arg6[%c0_13, %c0_14], %15 {strides = array<i32>} : memref<128x128xf32, #tpu.memory_space<vmem>>, vector<128x128xf32>,
    } else {
    }
    return
  }
  func.func @transform_0(%arg0: i32, %arg1: i32, %arg2: i32) -> (i32, i32) {
    %c0_i32 = arith.constant 0 : i32
    return %arg0, %arg2 : i32, i32
  }
  func.func @transform_1(%arg0: i32, %arg1: i32, %arg2: i32) -> (i32, i32) {
    %c0_i32 = arith.constant 0 : i32
    return %arg1, %arg2 : i32, i32
  }
  func.func @transform_2(%arg0: i32, %arg1: i32, %arg2: i32) -> (i32, i32) {
    %c0_i32 = arith.constant 0 : i32
    %c0_i32_0 = arith.constant 0 : i32
    return %c0_i32, %arg1 : i32, i32
  }
  func.func @transform_3(%arg0: i32, %arg1: i32, %arg2: i32) -> (i32, i32) {
    %c0_i32 = arith.constant 0 : i32
    return %arg0, %arg1 : i32, i32
  }
}

</mosaic_0001>

<bundles_post_ra>
// kernel: tpu_custom_call.1
= control target key start
LH: loop header
LB: loop body
LE: loop exit
PB: predicated region body
PF: predicated region fallthrough
CT: control target
= control target key end

     0   :  { %s1961_s0 = inlined_call_operand.hbm [shape: f32[256,256], index: 0, kind: input, shape index: {}]   ;;  %s1962_s1 = inlined_call_operand.hbm [shape: f32[768,256], index: 1, kind: input, shape index: {}]   ;;  %s1963_s2 = inlined_call_operand.hbm [shape: f32[1,768], index: 2, kind: input, shape index: {}]   ;;  %s1964_s3 = inlined_call_operand.hbm [shape: f32[256,768], index: 3, kind: output, shape index: {}]  }
   0x1   :  { %1986 = sst [smem:[#allocation27_spill]] %s1961_s0 }
   0x2   :  { %1987 = sst [smem:[#allocation28_spill]] %s1962_s1 }
   0x3   :  { %1988 = sst [smem:[#allocation29_spill]] %s1963_s2 }
   0x4   :  { %1989 = sst [smem:[#allocation30_spill]] %s1964_s3 }
   0x5   :  { %8 = vsyncpa [#allocation4], 0 }
   0x6   :  { %10 = vsyncpa [#allocation4 + $0x1], 0 }
   0x7   :  { %11 = vsyncpa [#allocation7], 0 }
   0x8   :  { %13 = vsyncpa [#allocation7 + $0x1], 0 }
   0x9   :  { %14 = vsyncpa [#allocation5], 0 }
   0xa   :  { %16 = vsyncpa [#allocation5 + $0x1], 0  ;;  %s1413_s12 = smov 0   ;;  %s1415_s13 = smov 0  }
   0xb   :  { %s1417_s14 = smov 0   ;;  %s1419_s15 = smov 0  }
   0xc   :  { %s1421_s16 = smov 0   ;;  %s1423_s17 = smov 0  }
   0xd   :  { %s1425_s18 = smov 0   ;;  %s1427_s19 = smov 0  }
   0xe   :  { %s1429_s20 = smov 0   ;;  %s1431_s21 = smov 0  }
   0xf   :  { %s1433_s22 = smov 0   ;;  %s1435_s23 = smov 0  }
  0x10   :  { %s1437_s24 = smov 0   ;;  %s1439_s25 = smov 0  }
  0x11   :  { %s1441_s26 = smov 0   ;;  %s1443_s27 = smov 0  }
  0x12   :  { %s1445_s28 = smov 0   ;;  %s1447_s29 = smov 0  }
  0x13   :  { %s1449_s30 = smov 0  }
  0x14 LB: > { %1990 = sst [smem:[#allocation14_spill]] %s1308_s12  ;;  %s34_s4 = sadd.s32 1, %s1368_s27  ;;  %s1380_s30 = sphi %s1449_s30, %s22_s30   ;;  %s1376_s29 = sphi %s1447_s29, %s2073_s29   ;;  %s1372_s28 = sphi %s1445_s28, %s2072_s28   ;;  %s1368_s27 = sphi %s1443_s27, %s2071_s27   ;;  %s1364_s26 = sphi %s1441_s26, %s2070_s26   ;;  %s1360_s25 = sphi %s1439_s25, %s2069_s25   ;;  %s1356_s24 = sphi %s1437_s24, %s2068_s24   ;;  %s1352_s23 = sphi %s1435_s23, %s2067_s23   ;;  %s1348_s22 = sphi %s1433_s22, %s2066_s22   ;;  %s1344_s21 = sphi %s1431_s21, %s2065_s21   ;;  %s1340_s20 = sphi %s1429_s20, %s2054_s20   ;;  %s1336_s19 = sphi %s1427_s19, %s2053_s19   ;;  %s1332_s18 = sphi %s1425_s18, %s2052_s18   ;;  %s1328_s17 = sphi %s1423_s17, %s2064_s17   ;;  %s1324_s16 = sphi %s1421_s16, %s2063_s16   ;;  %s1320_s15 = sphi %s1419_s15, %s2062_s15   ;;  %s1316_s14 = sphi %s1417_s14, %s2061_s14   ;;  %s1312_s13 = sphi %s1415_s13, %s2059_s13   ;;  %s1308_s12 = sphi %s1413_s12, %s2057_s12  }
  0x15   : > { %1991 = sst [smem:[#allocation15_spill]] %s1312_s13  ;;  %s37_s5 = sadd.s32 1, %s1372_s28 }
  0x16   : > { %1992 = sst [smem:[#allocation16_spill]] %s1320_s15  ;;  %p35_p0 = scmp.ge.s32.totalorder %s34_s4, 2 }
  0x17   : > { %1993 = sst [smem:[#allocation17_spill]] %s1332_s18  ;;  %p1974_p1 = scmp.eq.s32.totalorder %s1380_s30, 0 }
  0x18   : > { %1994 = sst [smem:[#allocation18_spill]] %s1336_s19  ;;  %s78_s6 = sadd.s32 1, %s1340_s20 }
  0x19   : > { %1995 = sst [smem:[#allocation19_spill]] %s1340_s20  ;;  %p85_p2 = scmp.ne.s32.totalorder %s1340_s20, %s1336_s19 }
  0x1a   : > { %1996 = sst [smem:[#allocation20_spill]] %s1356_s24  ;;  %s2075_s4 = smov (%p35_p0, %s34_s4), 0 }
  0x1b   : > { %1997 = sst [smem:[#allocation21_spill]] %s1360_s25  ;;  %s2077_s5 = smov (!%p35_p0, %s37_s5), %s1372_s28 }
  0x1c   : > { %1998 = sst [smem:[#allocation22_spill]] %s1364_s26  ;;  %s1521_s7 = ssub.s32 %s1368_s27, %s2075_s4 }
  0x1d   : > { %1999 = sst [smem:[#allocation23_spill]] %s2075_s4  ;;  %p1525_p3 = por %p85_p2, %p1974_p1 }
  0x1e   : > { %p1975_p4 = scmp.ge.s32.totalorder %s2077_s5, 6  ;;  %p1973_p6 = scmp.lt.s32.totalorder %s1380_s30, 24 }
  0x1f   : > { %s192_s4 = sand.u32 1, %s1380_s30   ;;  %s194_s3 = sand.u32 1, %s1340_s20  }
  0x20   : > { %s1536_s9 = scalar_select %p1975_p4, 0, %s2077_s5  }
  0x21   : > { %s775_s25 = sshll.u32 %s1372_s28, 5  ;;  %s756_s24 = sshll.u32 %s194_s3, 7 }
  0x22   : > { %2001 = sst [smem:[#allocation24_spill]] %s1536_s9  ;;  %s1540_s10 = ssub.s32 %s1372_s28, %s1536_s9 }
  0x23   : > { %s75_s11 = sor.u32 %s1540_s10, %s1521_s7  ;;  %s202_s2 = sadd.s32 %s1368_s27, %s775_s25 }
  0x24   : > { %p76_p7 = scmp.eq.s32.totalorder %s75_s11, 0  ;;  %s759_s12 = sshll.u32 %s202_s2, 7 }
  0x25   : > { %s2003_s1 = sld [smem:[#allocation28_spill]]  ;;  %s196_s9 = scalar_lea.vmem [#allocation6], %s756_s24 }
  0x26   : > { %s1548_s26 = scalar_select %p76_p7, %s1340_s20, %s78_s6  }
  0x27   : > { %s205_s19 = sshll.u32 %s196_s9, 4  ;;  %p1562_p8 = pnand %p1973_p6, %p1525_p3  ;;  %s1556_s19 = int_to_ptr.vmem [resolvable:$true] %s205_s19 }
  0x28   : > { %2002 = sst [smem:[#allocation25_spill]] %s1548_s26  ;;  %p230_p10 = scmp.lt.s32.totalorder %s1380_s30, 25 }
  0x29   : > { %s1568_s2 = scalar_lea.sflag [#allocation7], %s192_s4  ;;  %p1098_p12 = pneg %p1562_p8 }
  0x2b   : > { %s1554_s18 = scalar_lea.hbm %s2003_s1, %s759_s12  ;;  %s1101_s15 = scalar_lea.hbm %s2003_s1, 24576 }
  0x2c   : > { %s1096_s3 = scalar_lea.hbm %s1554_s18, 2048  ;;  %p1102_p2 = scmp.lt.u32.totalorder %s1554_s18, %s2003_s1 }
  0x2d   : > { %p1097_p11 = scmp.ne.s32.totalorder %s1554_s18, %s1096_s3  ;;  %p1103_p3 = scmp.lt.u32.totalorder %s1101_s15, %s1096_s3 }
  0x2e   : > { %p1105_p5 = scmp.lt.u32.totalorder %s1096_s3, %s1554_s18 }
  0x2f   : > { %p1099_p13 = pnand %p1098_p12, %p1097_p11  ;;  %p1104_p7 = por %p1103_p3, %p1102_p2 }
  0x31   : > { %p1100_p0 = pneg %p1099_p13  ;;  %p1106_p6 = por %p1105_p5, %p1104_p7 }
  0x33   : > { %p1107_p1 = pnand %p1106_p6, %p1100_p0 }
  0x35   : > { %1110 = shalt.err (!%p1107_p1)
}
  0x36   : > { %s1111_s4 = scalar_lea.vmem %s1556_s19, 2048  ;;  %s1382_s8 = smov [#allocation6]  }
  0x37   : > { %p1112_p11 = scmp.ne.s32.totalorder %s1556_s19, %s1111_s4  ;;  %s1116_s9 = sshll.u32 %s1382_s8, 4  ;;  %s1117_s9 = int_to_ptr.vmem [resolvable:$false] %s1116_s9 }
  0x38   : > { %s1118_s11 = scalar_lea.vmem %s1117_s9, 4096  ;;  %p1119_p9 = scmp.lt.s32.totalorder %s1556_s19, %s1117_s9 }
  0x39   : > { %p1114_p13 = pnand %p1112_p11, %p1098_p12  ;;  %p1120_p2 = scmp.lt.s32.totalorder %s1118_s11, %s1111_s4 }
  0x3b   : > { %p1115_p4 = pneg %p1114_p13  ;;  %p1121_p3 = por %p1120_p2, %p1119_p9 }
  0x3d   : > { %p1122_p5 = pnand %p1121_p3, %p1115_p4 }
  0x3f   : > { %1125 = shalt.err (!%p1122_p5)
}
  0x40   : > { %s1976_s3 = smov 256   ;;  %s1977_s12 = smov 128  }
  0x41   : > { %s1978_s13 = smov 8   ;;  %p2005_p1 = scmp.ge.s32.totalorder %s1380_s30, 1 }
  0x42   : > { %927 = dma.hbm_to_vmem [thread:$0]  (!%p1562_p8), %s1554_s18, 2048, %s1556_s19, %s1568_s2, %s1976_s3, %s1977_s12, %s1978_s13  }
  0x43   : > { %p1603_p4 = pnand %p2005_p1, %p230_p10  ;;  %s41_s24 = sadd.s32 1, %s1376_s29 }
  0x44   : > { %s50_s25 = sadd.s32 1, %s1352_s23  ;;  %p2008_p6 = scmp.ge.s32.totalorder %s2077_s5, 6 }
  0x45   : > { %s2006_s15 = scalar_select %p1603_p4, 1, 0 }
  0x46   : > { %s2079_s24 = smov (!%p2008_p6, %s41_s24), %s1376_s29  ;;  %p57_p9 = scmp.ne.s32.totalorder %s1352_s23, %s1348_s22 }
  0x47   : > { %2007 = sst [smem:[#allocation26_spill]] %s2006_s15  ;;  %p43_p0 = scmp.ge.s32.totalorder %s2079_s24, 2 }
  0x48   : > { %s132_s6 = sadd.s32 1, %s1316_s14  ;;  %p2009_p7 = scmp.eq.s32.totalorder %s1380_s30, 0 }
  0x49   : > { %s169_s19 = sand.u32 1, %s1352_s23   ;;  %s2081_s24 = smov (%p43_p0, %s2079_s24), 0 }
  0x4a   : > { %p1619_p8 = por %p2009_p7, %p57_p9  ;;  %s752_s5 = sshll.u32 %s169_s19, 7 }
  0x4b   : > { %s45_s4 = ssub.s32 %s1376_s29, %s2081_s24  ;;  %s774_s11 = sshll.u32 %s1376_s29, 5 }
  0x4c   : > { %s47_s8 = sor.u32 %s1521_s7, %s45_s4  ;;  %s129_s9 = sor.u32 %s1540_s10, %s45_s4 }
  0x4d   : > { %p48_p10 = scmp.eq.s32.totalorder %s47_s8, 0  ;;  %p130_p11 = scmp.eq.s32.totalorder %s129_s9, 0 }
  0x4e   : > { %s173_s3 = scalar_lea.vmem [#allocation3], %s752_s5  ;;  %s179_s26 = sadd.s32 %s1368_s27, %s774_s11 }
  0x4f   : > { %s182_s12 = sshll.u32 %s173_s3, 4  ;;  %s755_s20 = sshll.u32 %s179_s26, 7  ;;  %s1638_s12 = int_to_ptr.vmem [resolvable:$true] %s182_s12 }
  0x50   : > { %s1632_s13 = scalar_select %p48_p10, %s1352_s23, %s50_s25  }
  0x51   : > { %s1635_s1 = scalar_select %p130_p11, %s1316_s14, %s132_s6  }
  0x52   : > { %p2011_p13 = scmp.lt.s32.totalorder %s1380_s30, 24  ;;  %s2013_s0 = sld [smem:[#allocation27_spill]] }
  0x53   : > { %s1653_s25 = scalar_lea.sflag [#allocation4], %s169_s19 }
  0x54   : > { %p1644_p2 = pnand %p2011_p13, %p1619_p8 }
  0x56   : > { %p1128_p5 = pneg %p1644_p2 }
  0x58   : > { %s1651_s3 = scalar_lea.hbm %s2013_s0, %s755_s20  ;;  %s1131_s5 = scalar_lea.hbm %s2013_s0, 8192 }
  0x59   : > { %s1126_s26 = scalar_lea.hbm %s1651_s3, 2048  ;;  %p1132_p9 = scmp.lt.u32.totalorder %s1651_s3, %s2013_s0 }
  0x5a   : > { %p1127_p3 = scmp.ne.s32.totalorder %s1651_s3, %s1126_s26  ;;  %p1133_p0 = scmp.lt.u32.totalorder %s1131_s5, %s1126_s26 }
  0x5b   : > { %p1135_p8 = scmp.lt.u32.totalorder %s1126_s26, %s1651_s3 }
  0x5c   : > { %p1129_p1 = pnand %p1128_p5, %p1127_p3  ;;  %p1134_p7 = por %p1133_p0, %p1132_p9 }
  0x5e   : > { %p1130_p6 = pneg %p1129_p1  ;;  %p1136_p10 = por %p1135_p8, %p1134_p7 }
  0x60   : > { %p1137_p11 = pnand %p1136_p10, %p1130_p6 }
  0x62   : > { %1140 = shalt.err (!%p1137_p11)
}
  0x63   : > { %s1141_s19 = scalar_lea.vmem %s1638_s12, 2048  ;;  %s1386_s9 = smov [#allocation3]  }
  0x64   : > { %p1142_p13 = scmp.ne.s32.totalorder %s1638_s12, %s1141_s19  ;;  %s1146_s11 = sshll.u32 %s1386_s9, 4  ;;  %s1147_s11 = int_to_ptr.vmem [resolvable:$false] %s1146_s11 }
  0x65   : > { %s1148_s7 = scalar_lea.vmem %s1147_s11, 4096  ;;  %p1149_p12 = scmp.lt.s32.totalorder %s1638_s12, %s1147_s11 }
  0x66   : > { %p1144_p3 = pnand %p1142_p13, %p1128_p5  ;;  %p1150_p9 = scmp.lt.s32.totalorder %s1148_s7, %s1141_s19 }
  0x68   : > { %p1145_p1 = pneg %p1144_p3  ;;  %p1151_p0 = por %p1150_p9, %p1149_p12 }
  0x6a   : > { %p1152_p7 = pnand %p1151_p0, %p1145_p1 }
  0x6c   : > { %1155 = shalt.err (!%p1152_p7)
}
  0x6d   : > { %s2014_s4 = smov 8   ;;  %s2015_s26 = smov 128  }
  0x6e   : > { %s2016_s6 = smov 256   ;;  %s2017_s18 = sld [smem:[#allocation18_spill]] }
  0x6f   : > { %s2018_s5 = sld [smem:[#allocation17_spill]]  ;;  %s2019_s20 = sld [smem:[#allocation16_spill]] }
  0x70   : > { %s2020_s15 = sld [smem:[#allocation15_spill]]  ;;  %s2021_s8 = sld [smem:[#allocation14_spill]] }
  0x71   : > { %924 = dma.hbm_to_vmem [thread:$0]  (!%p1644_p2), %s1651_s3, 2048, %s1638_s12, %s1653_s25, %s2016_s6, %s2015_s26, %s2014_s4  }
  0x72   : > { %s1685_s19 = sadd.s32 4294967295, %s1380_s30   ;;  %s749_s9 = sadd.s32 4294967294, %s1380_s30  }
  0x73   : > { %p64_p12 = scmp.eq.s32.totalorder %s1685_s19, 0  ;;  %p102_p5 = scmp.eq.s32.totalorder %s1540_s10, 0 }
  0x74   : > { %s104_s11 = sadd.s32 1, %s1328_s17  ;;  %p111_p6 = scmp.ne.s32.totalorder %s1328_s17, %s1324_s16 }
  0x75   : > { %p2022_p8 = scmp.ne.s32.totalorder %s1348_s22, %s1344_s21  ;;  %p2024_p11 = scmp.ne.s32.totalorder %s2017_s18, %s2018_s5 }
  0x76   : > { %s1708_s12 = scalar_select %p102_p5, %s1328_s17, %s104_s11  }
  0x77   : > { %p1696_p10 = por %p64_p12, %p2022_p8  ;;  %p1703_p13 = por %p2024_p11, %p64_p12 }
  0x78   : > { %p2026_p2 = scmp.eq.s32.totalorder %s1380_s30, 0  ;;  %p117_p1 = scmp.ne.s32.totalorder %s1324_s16, %s2019_s20 }
  0x79   : > { %s2023_s7 = scalar_select %p1696_p10, 1, 0 }
  0x7a   : > { %s2025_s0 = scalar_select %p1703_p13, 1, 0 }
  0x7b   : > { %p1712_p3 = por %p111_p6, %p2026_p2  ;;  %p142_p9 = scmp.ne.s32.totalorder %s1316_s14, %s2020_s15 }
  0x7c   : > { %p143_p0 = scmp.eq.s32.totalorder %s1685_s19, 23  ;;  %p1721_p7 = por %p117_p1, %p64_p12 }
  0x7d   : > { %p148_p8 = scmp.ne.s32.totalorder %s2020_s15, %s2021_s8  ;;  %p149_p5 = scmp.eq.s32.totalorder %s749_s9, 23 }
  0x7e   : > { %s2028_s21 = scalar_select %p1721_p7, 1, 0 }
  0x7f   : > { %p1727_p11 = por %p143_p0, %p142_p9  ;;  %s217_s25 = sand.u32 1, %s1328_s17  }
  0x80   : > { %s760_s4 = sshll.u32 %s1372_s28, 4  ;;  %p1733_p6 = por %p149_p5, %p148_p8 }
  0x81   : > { %s2029_s10 = scalar_select %p1727_p11, 1, 0 }
  0x82   : > { %s2030_s26 = scalar_select %p1733_p6, 1, 0 }
  0x83   : > { %s2031_s5 = sld [smem:[#allocation29_spill]]  ;;  %s218_s15 = scalar_lea.vmem [#allocation8], %s217_s25 }
  0x84   : > { %s225_s8 = sshll.u32 %s218_s15, 4  ;;  %p2032_p12 = scmp.lt.s32.totalorder %s1380_s30, 24  ;;  %s1742_s8 = int_to_ptr.vmem [resolvable:$true] %s225_s8 }
  0x86   : > { %p1748_p2 = pnand %p2032_p12, %p1712_p3 }
  0x88   : > { %p1158_p9 = pneg %p1748_p2 }
  0x89   : > { %s1740_s20 = scalar_lea.hbm %s2031_s5, %s760_s4  ;;  %s1161_s6 = scalar_lea.hbm %s2031_s5, 96 }
  0x8a   : > { %s1156_s11 = scalar_lea.hbm %s1740_s20, 16  ;;  %p1162_p3 = scmp.lt.u32.totalorder %s1740_s20, %s2031_s5 }
  0x8b   : > { %p1157_p1 = scmp.ne.s32.totalorder %s1740_s20, %s1156_s11  ;;  %p1163_p5 = scmp.lt.u32.totalorder %s1161_s6, %s1156_s11 }
  0x8c   : > { %p1165_p6 = scmp.lt.u32.totalorder %s1156_s11, %s1740_s20 }
  0x8d   : > { %p1159_p0 = pnand %p1158_p9, %p1157_p1  ;;  %p1164_p12 = por %p1163_p5, %p1162_p3 }
  0x8f   : > { %p1160_p8 = pneg %p1159_p0  ;;  %p1166_p11 = por %p1165_p6, %p1164_p12 }
  0x91   : > { %p1167_p7 = pnand %p1166_p11, %p1160_p8 }
  0x93   : > { %1170 = shalt.err (!%p1167_p7)
}
  0x94   : > { %s1171_s15 = scalar_lea.vmem %s1742_s8, 16  ;;  %s1387_s25 = smov [#allocation8]  }
  0x95   : > { %p1172_p1 = scmp.ne.s32.totalorder %s1742_s8, %s1171_s15  ;;  %s1176_s4 = sshll.u32 %s1387_s25, 4  ;;  %s1177_s4 = int_to_ptr.vmem [resolvable:$false] %s1176_s4 }
  0x96   : > { %s1178_s3 = scalar_lea.vmem %s1177_s4, 32  ;;  %p1179_p10 = scmp.lt.s32.totalorder %s1742_s8, %s1177_s4 }
  0x97   : > { %p1174_p0 = pnand %p1172_p1, %p1158_p9  ;;  %p1180_p3 = scmp.lt.s32.totalorder %s1178_s3, %s1171_s15 }
  0x99   : > { %p1175_p13 = pneg %p1174_p0  ;;  %p1181_p5 = por %p1180_p3, %p1179_p10 }
  0x9b   : > { %p1182_p6 = pnand %p1181_p5, %p1175_p13 }
  0x9d   : > { %1185 = shalt.err (!%p1182_p6)
}
  0x9e   : > { %930 = dma.hbm_to_vmem [thread:$0]  (!%p1748_p2), %s1740_s20, 16, %s1742_s8, %s1568_s2  }
  0x9f   : > { %234 = sbr.rel (%p1603_p4) target bundleno = 531 (0x213), region = 32  ;;  %s236_s6 = sand.u32 (!%p1603_p4), 1, %s1348_s22  }
  0xa0   : > { %s762_s18 = sshll.u32 (!%p1603_p4), %s236_s6, 7  ;;  %s237_s25 = scalar_lea.sflag (!%p1603_p4), [#allocation4], %s236_s6 }
  0xa1   : > { %s1781_s5 = scalar_lea.vmem (!%p1603_p4), [#allocation3], %s762_s18  ;;  %p2035_p7 = scmp.ne.s32.totalorder (!%p1603_p4), %s2023_s7, 0 }
  0xa6   : > { %1291 = dma.done.wait (%p2035_p7), %s237_s25, 2048  }
  0xa7   : > { %1293 = vsyncadd (%p2035_p7), %s237_s25, 4294965248  ;;  %s2036_s9 = sld [smem:[#allocation18_spill]]  ;;  %s245_s15 = sand.u32 1, %s1685_s19  }
  0xa8   : > { %s246_s8 = scalar_lea.sflag [#allocation7], %s245_s15  ;;  %p2037_p4 = scmp.ne.s32.totalorder %s2025_s0, 0 }
  0xad   : > { %s247_s2 = sand.u32 1, %s2036_s9  }
  0xae   : > { %s763_s20 = sshll.u32 %s247_s2, 7 }
  0xaf   : > { %s1789_s4 = scalar_lea.vmem [#allocation6], %s763_s20 }
  0xb0   : > { %1295 = dma.done.wait (%p2037_p4), %s246_s8, 2048  }
  0xb1   : > { %1297 = vsyncadd (%p2037_p4), %s246_s8, 4294965248  ;;  %s256_s3 = sand.u32 1, %s1324_s16   ;;  %p2038_p10 = scmp.ne.s32.totalorder %s2028_s21, 0 }
  0xb2   : > { %s1796_s11 = scalar_lea.vmem [#allocation8], %s256_s3 }
  0xb3   : > { %1299 = dma.done.wait (%p2038_p10), %s246_s8, 16  }
  0xb4   : > { %1301 = vsyncadd (%p2038_p10), %s246_s8, 4294967280  ;;  %s2039_s19 = sld [smem:[#allocation15_spill]]  ;;  %s2040_s25 = sld [smem:[#allocation20_spill]] }
  0xba   : > { %s286_s7 = sand.u32 1, %s2039_s19   ;;  %p765_p13 = scmp.ne.s32.totalorder %s2040_s25, 0 }
  0xbb   : > { %s764_s6 = sshll.u32 %s286_s7, 7  ;;  %v1388_v0 = vmov (!%p765_p13), 0.0  }
  0xbc   : > { %s1805_s18 = scalar_lea.vmem [#allocation9], %s764_s6  ;;  %295 = sbr.rel (%p765_p13) target bundleno = 196 (0xc4), region = 48  ;;  %296 = vst [vmem:[#allocation2] sm:$0xff] (!%p765_p13), %v1388_v0  ;;  %297 = vst [vmem:[#allocation2 + $0x8] sm:$0xff] (!%p765_p13), %v1388_v0 }
  0xbd   : > { %298 = vst [vmem:[#allocation2 + $0x10] sm:$0xff] (!%p765_p13), %v1388_v0  ;;  %299 = vst [vmem:[#allocation2 + $0x18] sm:$0xff] (!%p765_p13), %v1388_v0 }
  0xbe   : > { %300 = vst [vmem:[#allocation2 + $0x20] sm:$0xff] (!%p765_p13), %v1388_v0  ;;  %301 = vst [vmem:[#allocation2 + $0x28] sm:$0xff] (!%p765_p13), %v1388_v0 }
  0xbf   : > { %302 = vst [vmem:[#allocation2 + $0x30] sm:$0xff] (!%p765_p13), %v1388_v0  ;;  %303 = vst [vmem:[#allocation2 + $0x38] sm:$0xff] (!%p765_p13), %v1388_v0 }
  0xc0   : > { %304 = vst [vmem:[#allocation2 + $0x40] sm:$0xff] (!%p765_p13), %v1388_v0  ;;  %305 = vst [vmem:[#allocation2 + $0x48] sm:$0xff] (!%p765_p13), %v1388_v0 }
  0xc1   : > { %306 = vst [vmem:[#allocation2 + $0x50] sm:$0xff] (!%p765_p13), %v1388_v0  ;;  %307 = vst [vmem:[#allocation2 + $0x58] sm:$0xff] (!%p765_p13), %v1388_v0 }
  0xc2   : > { %308 = vst [vmem:[#allocation2 + $0x60] sm:$0xff] (!%p765_p13), %v1388_v0  ;;  %309 = vst [vmem:[#allocation2 + $0x68] sm:$0xff] (!%p765_p13), %v1388_v0 }
  0xc3   : > { %310 = vst [vmem:[#allocation2 + $0x70] sm:$0xff] %v1388_v0  ;;  %311 = vst [vmem:[#allocation2 + $0x78] sm:$0xff] %v1388_v0 }
  0xc4 PF: > { %v344_v1 = vld [vmem:[%s1789_s4] sm:$0xff]  ;;  %v345_v2 = vld [vmem:[%s1789_s4 + $0x8] sm:$0xff]  ;;  %v346_v3 = vld [vmem:[%s1789_s4 + $0x10] sm:$0xff]  ;;  %s2041_s0 = sld [smem:[#allocation20_spill]] }
  0xc5   : > { %v864_v4 = vpack.c.bf16 %v345_v2, %v344_v1  ;;  %v347_v5 = vld [vmem:[%s1789_s4 + $0x18] sm:$0xff]  ;;  %v328_v7 = vld [vmem:[%s1781_s5] sm:$0xff]  ;;  %v349_v10 = vld [vmem:[%s1789_s4 + $0x28] sm:$0xff] }
  0xc6   : > { %v868_v6 = vpack.c.bf16 %v347_v5, %v346_v3  ;;  %v336_v8 = vld [vmem:[%s1781_s5 + $0x40] sm:$0xff]  ;;  %840 = vmatprep.mubr.f32.mxu0 %v328_v7  ;;  %v350_v12 = vld [vmem:[%s1789_s4 + $0x30] sm:$0xff]  ;;  %v351_v13 = vld [vmem:[%s1789_s4 + $0x38] sm:$0xff] }
  0xc7   : > { %865 = vmatprep.subr.bf16.mxu0 %v864_v4  ;;  %896 = vmatprep.subr.bf16.mxu1 %v864_v4  ;;  %v348_v9 = vld [vmem:[%s1789_s4 + $0x20] sm:$0xff]  ;;  %v876_v14 = vpack.c.bf16 %v351_v13, %v350_v12  ;;  %v353_v16 = vld [vmem:[%s1789_s4 + $0x48] sm:$0xff]  ;;  %v354_v18 = vld [vmem:[%s1789_s4 + $0x50] sm:$0xff] }
  0xc8   : > { %867 = vmatpush3.bf16.xpose.msra.mxu0 %v864_v4  ;;  %904 = vmatpush3.bf16.xpose.msra.mxu1 %v864_v4  ;;  %v872_v11 = vpack.c.bf16 %v349_v10, %v348_v9  ;;  %v352_v15 = vld [vmem:[%s1789_s4 + $0x40] sm:$0xff]  ;;  %v355_v19 = vld [vmem:[%s1789_s4 + $0x58] sm:$0xff]  ;;  %v357_v22 = vld [vmem:[%s1789_s4 + $0x68] sm:$0xff] }
  0xc9   : > { %869 = vmatprep.subr.bf16.mxu0 %v868_v6  ;;  %897 = vmatprep.subr.bf16.mxu1 %v868_v6  ;;  %v880_v17 = vpack.c.bf16 %v353_v16, %v352_v15  ;;  %v884_v20 = vpack.c.bf16 %v355_v19, %v354_v18  ;;  %v356_v21 = vld [vmem:[%s1789_s4 + $0x60] sm:$0xff]  ;;  %v358_v24 = vld [vmem:[%s1789_s4 + $0x70] sm:$0xff]  ;;  %v359_v25 = vld [vmem:[%s1789_s4 + $0x78] sm:$0xff] }
  0xca   : > { %852 = vmatprep.mubr.f32.mxu1 %v336_v8  ;;  %v888_v23 = vpack.c.bf16 %v357_v22, %v356_v21  ;;  %v892_v26 = vpack.c.bf16 %v359_v25, %v358_v24  ;;  %v329_v27 = vld [vmem:[%s1781_s5 + $0x8] sm:$0xff]  ;;  %v330_v29 = vld [vmem:[%s1781_s5 + $0x10] sm:$0xff]  ;;  %v331_v31 = vld [vmem:[%s1781_s5 + $0x18] sm:$0xff]  ;;  %p766_p11 = scmp.ne.s32.totalorder %s2041_s0, 1 }
  0xcb   : > { %v337_v28 = vld [vmem:[%s1781_s5 + $0x48] sm:$0xff]  ;;  %v338_v30 = vld [vmem:[%s1781_s5 + $0x50] sm:$0xff]  ;;  %v339_v32 = vld [vmem:[%s1781_s5 + $0x58] sm:$0xff] }
  0xcc   : > { %v332_v33 = vld [vmem:[%s1781_s5 + $0x20] sm:$0xff]  ;;  %v333_v35 = vld [vmem:[%s1781_s5 + $0x28] sm:$0xff]  ;;  %v334_v37 = vld [vmem:[%s1781_s5 + $0x30] sm:$0xff] }
  0xcd   : > { %v340_v34 = vld [vmem:[%s1781_s5 + $0x60] sm:$0xff]  ;;  %v341_v36 = vld [vmem:[%s1781_s5 + $0x68] sm:$0xff]  ;;  %v342_v38 = vld [vmem:[%s1781_s5 + $0x70] sm:$0xff] }
  0xce   : > { %v335_v39 = vld [vmem:[%s1781_s5 + $0x38] sm:$0xff]  ;;  %v313_v41 = vld [vmem:[#allocation2 + $0x8] sm:$0xff]  ;;  %v312_v43 = vld [vmem:[#allocation2] sm:$0xff] }
  0xcf   : > { %v343_v40 = vld [vmem:[%s1781_s5 + $0x78] sm:$0xff]  ;;  %v321_v42 = vld [vmem:[#allocation2 + $0x48] sm:$0xff]  ;;  %v320_v44 = vld [vmem:[#allocation2 + $0x40] sm:$0xff] }
  0xd0   : > { %871 = vmatpush3.bf16.xpose.msra.mxu0 %v868_v6  ;;  %905 = vmatpush3.bf16.xpose.msra.mxu1 %v868_v6  ;;  %v315_v53 = vld [vmem:[#allocation2 + $0x18] sm:$0xff]  ;;  %v314_v55 = vld [vmem:[#allocation2 + $0x10] sm:$0xff]  ;;  %v317_v1 = vld [vmem:[#allocation2 + $0x28] sm:$0xff] }
  0xd1   : > { %873 = vmatprep.subr.bf16.mxu0 %v872_v11  ;;  %898 = vmatprep.subr.bf16.mxu1 %v872_v11  ;;  %v323_v54 = vld [vmem:[#allocation2 + $0x58] sm:$0xff]  ;;  %v322_v56 = vld [vmem:[#allocation2 + $0x50] sm:$0xff]  ;;  %v325_v2 = vld [vmem:[#allocation2 + $0x68] sm:$0xff] }
  0xd2   : > { %v316_v3 = vld [vmem:[#allocation2 + $0x20] sm:$0xff]  ;;  %v319_v13 = vld [vmem:[#allocation2 + $0x38] sm:$0xff]  ;;  %v318_v15 = vld [vmem:[#allocation2 + $0x30] sm:$0xff] }
  0xd3   : > { %v324_v4 = vld [vmem:[#allocation2 + $0x60] sm:$0xff]  ;;  %v326_v16 = vld [vmem:[#allocation2 + $0x70] sm:$0xff] }
  0xd8   : > { %875 = vmatpush3.bf16.xpose.msra.mxu0 %v872_v11  ;;  %906 = vmatpush3.bf16.xpose.msra.mxu1 %v872_v11 }
  0xd9   : > { %877 = vmatprep.subr.bf16.mxu0 %v876_v14  ;;  %899 = vmatprep.subr.bf16.mxu1 %v876_v14 }
  0xe0   : > { %879 = vmatpush3.bf16.xpose.msra.mxu0 %v876_v14  ;;  %907 = vmatpush3.bf16.xpose.msra.mxu1 %v876_v14  ;;  %v327_v14 = vld [vmem:[#allocation2 + $0x78] sm:$0xff] }
  0xe1   : > { %881 = vmatprep.subr.bf16.mxu0 %v880_v17  ;;  %900 = vmatprep.subr.bf16.mxu1 %v880_v17 }
  0xe8   : > { %883 = vmatpush3.bf16.xpose.msra.mxu0 %v880_v17  ;;  %908 = vmatpush3.bf16.xpose.msra.mxu1 %v880_v17 }
  0xe9   : > { %885 = vmatprep.subr.bf16.mxu0 %v884_v20  ;;  %901 = vmatprep.subr.bf16.mxu1 %v884_v20 }
  0xf0   : > { %887 = vmatpush3.bf16.xpose.msra.mxu0 %v884_v20  ;;  %909 = vmatpush3.bf16.xpose.msra.mxu1 %v884_v20 }
  0xf1   : > { %889 = vmatprep.subr.bf16.mxu0 %v888_v23  ;;  %902 = vmatprep.subr.bf16.mxu1 %v888_v23 }
  0xf8   : > { %891 = vmatpush3.bf16.xpose.msra.mxu0 %v888_v23  ;;  %910 = vmatpush3.bf16.xpose.msra.mxu1 %v888_v23 }
  0xf9   : > { %893 = vmatprep.subr.bf16.mxu0 %v892_v26  ;;  %903 = vmatprep.subr.bf16.mxu1 %v892_v26 }
 0x100   : > { %895 = vmatpush3.bf16.xpose.msra.mxu0 %v892_v26  ;;  %911 = vmatpush3.bf16.xpose.msra.mxu1 %v892_v26  ;;  %v767_v26 = vld [vmem:[%s1796_s11] ss:$0 sm:$0xff] (!%p766_p11) }
 0x107   : > { %841 = vmatmul.mubr.f32.vlgmr.msra.gmra.mrb[0].mxu0 %v329_v27  ;;  %853 = vmatmul.mubr.f32.vlgmr.msra.gmra.mrb[0].mxu1 %v337_v28 }
 0x108   : > { %843 = vmatprep.mubr.f32.mxu0 %v330_v29  ;;  %855 = vmatprep.mubr.f32.mxu1 %v338_v30 }
 0x10b   : > { %844 = vmatmul.mubr.f32.gmra.mrb[2].mxu0 %v331_v31  ;;  %856 = vmatmul.mubr.f32.gmra.mrb[2].mxu1 %v339_v32 }
 0x10c   : > { %846 = vmatprep.mubr.f32.mxu0 %v332_v33  ;;  %858 = vmatprep.mubr.f32.mxu1 %v340_v34 }
 0x10f   : > { %847 = vmatmul.mubr.f32.gmra.mrb[4].mxu0 %v333_v35  ;;  %859 = vmatmul.mubr.f32.gmra.mrb[4].mxu1 %v341_v36 }
 0x110   : > { %849 = vmatprep.mubr.f32.mxu0 %v334_v37  ;;  %861 = vmatprep.mubr.f32.mxu1 %v342_v38 }
 0x113   : > { %850 = vmatmul.mubr.f32.gmra.mrb[6].mxu0 %v335_v39  ;;  %862 = vmatmul.mubr.f32.gmra.mrb[6].mxu1 %v343_v40 }
 0x1da   : > { %v842_v45 = vpop.f32.mrb[0].mxu0  ;;  %v854_v46 = vpop.f32.mrb[0].mxu1 }
 0x1db   : > { %v506_v47 = vadd.f32 %v842_v45, %v313_v41  ;;  %v514_v48 = vadd.f32 %v854_v46, %v321_v42  ;;  %v426_v49 = vpop.f32.mrb[1].mxu0  ;;  %v466_v50 = vpop.f32.mrb[1].mxu1 }
 0x1dc   : > { %v505_v51 = vadd.f32 %v426_v49, %v312_v43  ;;  %v513_v52 = vadd.f32 %v466_v50, %v320_v44 }
 0x1dd   : > { %522 = vst [vmem:[#allocation2 + $0x8] sm:$0xff] %v506_v47  ;;  %530 = vst [vmem:[#allocation2 + $0x48] sm:$0xff] %v514_v48 }
 0x1de   : > { %521 = vst [vmem:[#allocation2] sm:$0xff] %v505_v51  ;;  %529 = vst [vmem:[#allocation2 + $0x40] sm:$0xff] %v513_v52  ;;  %v845_v57 = vpop.f32.mrb[2].mxu0  ;;  %v857_v58 = vpop.f32.mrb[2].mxu1 }
 0x1df   : > { %v508_v59 = vadd.f32 %v845_v57, %v315_v53  ;;  %v516_v60 = vadd.f32 %v857_v58, %v323_v54  ;;  %v436_v61 = vpop.f32.mrb[3].mxu0  ;;  %v476_v62 = vpop.f32.mrb[3].mxu1 }
 0x1e0   : > { %v507_v63 = vadd.f32 %v436_v61, %v314_v55  ;;  %v515_v0 = vadd.f32 %v476_v62, %v322_v56 }
 0x1e1   : > { %524 = vst [vmem:[#allocation2 + $0x18] sm:$0xff] %v508_v59  ;;  %532 = vst [vmem:[#allocation2 + $0x58] sm:$0xff] %v516_v60 }
 0x1e2   : > { %523 = vst [vmem:[#allocation2 + $0x10] sm:$0xff] %v507_v63  ;;  %531 = vst [vmem:[#allocation2 + $0x50] sm:$0xff] %v515_v0  ;;  %v848_v5 = vpop.f32.mrb[4].mxu0  ;;  %v860_v6 = vpop.f32.mrb[4].mxu1 }
 0x1e3   : > { %v510_v7 = vadd.f32 %v848_v5, %v317_v1  ;;  %v518_v8 = vadd.f32 %v860_v6, %v325_v2  ;;  %v446_v9 = vpop.f32.mrb[5].mxu0  ;;  %v486_v10 = vpop.f32.mrb[5].mxu1 }
 0x1e4   : > { %v509_v11 = vadd.f32 %v446_v9, %v316_v3  ;;  %v517_v12 = vadd.f32 %v486_v10, %v324_v4  ;;  %540 = sbr.rel (%p766_p11) target bundleno = 502 (0x1f6), region = 52  ;;  %v542_v27 = vld [vmem:[#allocation2 + $0x8] sm:$0xff] (!%p766_p11) }
 0x1e5   : > { %526 = vst [vmem:[#allocation2 + $0x28] sm:$0xff] %v510_v7  ;;  %534 = vst [vmem:[#allocation2 + $0x68] sm:$0xff] %v518_v8  ;;  %v541_v25 = vld [vmem:[#allocation2] sm:$0xff] (!%p766_p11)  ;;  %v565_v29 = vadd.f32 (!%p766_p11), %v767_v26, %v542_v27  ;;  %v550_v43 = vld [vmem:[#allocation2 + $0x48] sm:$0xff] (!%p766_p11) }
 0x1e6   : > { %525 = vst [vmem:[#allocation2 + $0x20] sm:$0xff] %v509_v11  ;;  %533 = vst [vmem:[#allocation2 + $0x60] sm:$0xff] %v517_v12  ;;  %v851_v17 = vpop.f32.mrb[6].mxu0  ;;  %v863_v18 = vpop.f32.mrb[6].mxu1  ;;  %v564_v28 = vadd.f32 (!%p766_p11), %v767_v26, %v541_v25  ;;  %v549_v42 = vld [vmem:[#allocation2 + $0x40] sm:$0xff] (!%p766_p11)  ;;  %v573_v46 = vadd.f32 (!%p766_p11), %v767_v26, %v550_v43 }
 0x1e7   : > { %v512_v19 = vadd.f32 %v851_v17, %v319_v13  ;;  %v520_v20 = vadd.f32 %v863_v18, %v327_v14  ;;  %v456_v21 = vpop.f32.mrb[7].mxu0  ;;  %v496_v22 = vpop.f32.mrb[7].mxu1  ;;  %581 = vst [vmem:[%s1805_s18 + $0x8] sm:$0xff] (!%p766_p11), %v565_v29  ;;  %v572_v45 = vadd.f32 (!%p766_p11), %v767_v26, %v549_v42 }
 0x1e8   : > { %v511_v23 = vadd.f32 %v456_v21, %v318_v15  ;;  %v519_v24 = vadd.f32 %v496_v22, %v326_v16  ;;  %v544_v31 = vld [vmem:[#allocation2 + $0x18] sm:$0xff] (!%p766_p11)  ;;  %580 = vst [vmem:[%s1805_s18] sm:$0xff] (!%p766_p11), %v564_v28  ;;  %589 = vst [vmem:[%s1805_s18 + $0x48] sm:$0xff] (!%p766_p11), %v573_v46 }
 0x1e9   : > { %528 = vst [vmem:[#allocation2 + $0x38] sm:$0xff] %v512_v19  ;;  %536 = vst [vmem:[#allocation2 + $0x78] sm:$0xff] %v520_v20  ;;  %v543_v30 = vld [vmem:[#allocation2 + $0x10] sm:$0xff] (!%p766_p11)  ;;  %v567_v34 = vadd.f32 (!%p766_p11), %v767_v26, %v544_v31  ;;  %v552_v48 = vld [vmem:[#allocation2 + $0x58] sm:$0xff] (!%p766_p11) }
 0x1ea   : > { %527 = vst [vmem:[#allocation2 + $0x30] sm:$0xff] %v511_v23  ;;  %535 = vst [vmem:[#allocation2 + $0x70] sm:$0xff] %v519_v24  ;;  %v566_v33 = vadd.f32 (!%p766_p11), %v767_v26, %v543_v30  ;;  %v551_v44 = vld [vmem:[#allocation2 + $0x50] sm:$0xff] (!%p766_p11)  ;;  %v575_v51 = vadd.f32 (!%p766_p11), %v767_v26, %v552_v48 }
 0x1eb   : > { %583 = vst [vmem:[%s1805_s18 + $0x18] sm:$0xff] %v567_v34  ;;  %v574_v47 = vadd.f32 %v767_v26, %v551_v44  ;;  %588 = vst [vmem:[%s1805_s18 + $0x40] sm:$0xff] %v572_v45 }
 0x1ec   : > { %v546_v36 = vld [vmem:[#allocation2 + $0x28] sm:$0xff]  ;;  %582 = vst [vmem:[%s1805_s18 + $0x10] sm:$0xff] %v566_v33  ;;  %591 = vst [vmem:[%s1805_s18 + $0x58] sm:$0xff] %v575_v51 }
 0x1ed   : > { %v545_v32 = vld [vmem:[#allocation2 + $0x20] sm:$0xff]  ;;  %v569_v39 = vadd.f32 %v767_v26, %v546_v36  ;;  %v554_v50 = vld [vmem:[#allocation2 + $0x68] sm:$0xff]  ;;  %590 = vst [vmem:[%s1805_s18 + $0x50] sm:$0xff] %v574_v47 }
 0x1ee   : > { %v568_v35 = vadd.f32 %v767_v26, %v545_v32  ;;  %v553_v49 = vld [vmem:[#allocation2 + $0x60] sm:$0xff]  ;;  %v577_v53 = vadd.f32 %v767_v26, %v554_v50 }
 0x1ef   : > { %585 = vst [vmem:[%s1805_s18 + $0x28] sm:$0xff] %v569_v39  ;;  %v576_v52 = vadd.f32 %v767_v26, %v553_v49 }
 0x1f0   : > { %v548_v38 = vld [vmem:[#allocation2 + $0x38] sm:$0xff]  ;;  %584 = vst [vmem:[%s1805_s18 + $0x20] sm:$0xff] %v568_v35  ;;  %593 = vst [vmem:[%s1805_s18 + $0x68] sm:$0xff] %v577_v53 }
 0x1f1   : > { %v547_v37 = vld [vmem:[#allocation2 + $0x30] sm:$0xff]  ;;  %v571_v41 = vadd.f32 %v767_v26, %v548_v38  ;;  %v556_v55 = vld [vmem:[#allocation2 + $0x78] sm:$0xff]  ;;  %592 = vst [vmem:[%s1805_s18 + $0x60] sm:$0xff] %v576_v52 }
 0x1f2   : > { %v570_v40 = vadd.f32 %v767_v26, %v547_v37  ;;  %v555_v54 = vld [vmem:[#allocation2 + $0x70] sm:$0xff]  ;;  %v579_v57 = vadd.f32 %v767_v26, %v556_v55 }
 0x1f3   : > { %587 = vst [vmem:[%s1805_s18 + $0x38] sm:$0xff] %v571_v41  ;;  %v578_v56 = vadd.f32 %v767_v26, %v555_v54 }
 0x1f4   : > { %586 = vst [vmem:[%s1805_s18 + $0x30] sm:$0xff] %v570_v40  ;;  %595 = vst [vmem:[%s1805_s18 + $0x78] sm:$0xff] %v579_v57 }
 0x1f5   : > { %594 = vst [vmem:[%s1805_s18 + $0x70] sm:$0xff] %v578_v56 }
 0x1f6 PF: > { %s2042_s21 = sld [smem:[#allocation22_spill]]  ;;  %s2043_s5 = sld [smem:[#allocation21_spill]] }
 0x1f7   : > { %s612_s2 = sshll.u32 %s1805_s18, 4  ;;  %s2045_s11 = sld [smem:[#allocation30_spill]]  ;;  %s1861_s2 = int_to_ptr.vmem [resolvable:$true] %s612_s2 }
 0x1f8   : > { %s1870_s6 = scalar_lea.sflag [#allocation5], %s286_s7  ;;  %s1186_s25 = scalar_lea.vmem %s1861_s2, 2048 }
 0x1f9   : > { %p1187_p2 = scmp.ne.s32.totalorder %s1861_s2, %s1186_s25  ;;  %p2046_p9 = scmp.ne.s32.totalorder %s2029_s10, 0 }
 0x1fa   : > { %s1389_s18 = smov [#allocation9]  }
 0x1fb   : > { %p1188_p8 = pnand %p1187_p2, %p2046_p9  ;;  %s1190_s0 = sshll.u32 %s1389_s18, 4  ;;  %s1191_s0 = int_to_ptr.vmem [resolvable:$false] %s1190_s0 }
 0x1fc   : > { %s912_s15 = smul.u32 96, %s2042_s21  ;;  %s1192_s21 = scalar_lea.vmem %s1191_s0, 4096 }
 0x1fd   : > { %p1189_p12 = pneg %p1188_p8  ;;  %p1193_p1 = scmp.lt.s32.totalorder %s1861_s2, %s1191_s0 }
 0x1fe   : > { %s609_s20 = sadd.s32 %s2043_s5, %s912_s15  ;;  %p1194_p0 = scmp.lt.s32.totalorder %s1192_s21, %s1186_s25 }
 0x1ff   : > { %s771_s8 = sshll.u32 %s609_s20, 7 }
 0x200   : > { %s1866_s19 = scalar_lea.hbm %s2045_s11, %s771_s8  ;;  %p1195_p3 = por %p1194_p0, %p1193_p1 }
 0x202   : > { %p1196_p5 = pnand %p1195_p3, %p1189_p12 }
 0x204   : > { %1199 = shalt.err (!%p1196_p5)
}
 0x205   : > { %s1200_s7 = scalar_lea.hbm %s1866_s19, 2048  ;;  %s1204_s15 = scalar_lea.hbm %s2045_s11, 24576 }
 0x206   : > { %p1201_p6 = scmp.ne.s32.totalorder %s1866_s19, %s1200_s7  ;;  %p1205_p10 = scmp.lt.u32.totalorder %s1866_s19, %s2045_s11 }
 0x207   : > { %p1206_p13 = scmp.lt.u32.totalorder %s1204_s15, %s1200_s7  ;;  %p1208_p2 = scmp.lt.u32.totalorder %s1200_s7, %s1866_s19 }
 0x208   : > { %p1202_p7 = pnand %p1201_p6, %p2046_p9 }
 0x209   : > { %p1207_p11 = por %p1206_p13, %p1205_p10 }
 0x20a   : > { %p1203_p4 = pneg %p1202_p7 }
 0x20b   : > { %p1209_p8 = por %p1208_p2, %p1207_p11 }
 0x20d   : > { %p1210_p12 = pnand %p1209_p8, %p1203_p4 }
 0x20f   : > { %1213 = shalt.err (!%p1210_p12)
}
 0x210   : > { %s1390_s4 = smov 128   ;;  %s1391_s3 = smov 768  }
 0x211   : > { %s1392_s25 = smov 8  }
 0x212   : > { %919 = dma.vmem_to_hbm [thread:$0]  (%p2046_p9), %s1861_s2, 2048, %s1866_s19, %s1870_s6, %s1390_s4, %s1391_s3, %s1392_s25  }
 0x213 PF: > { %s2047_s18 = sld [smem:[#allocation14_spill]]  ;;  %p936_p1 = scmp.ge.s32.totalorder %s1380_s30, 2 }
 0x214   : > { %p2048_p0 = scmp.ne.s32.totalorder %s2030_s26, 0 }
 0x216   : > { %p932_p3 = pnand %p936_p1, %p2048_p0 }
 0x219   : > { %s627_s0 = sand.u32 1, %s2047_s18  }
 0x21a   : > { %s628_s21 = scalar_lea.sflag [#allocation5], %s627_s0 }
 0x21b   : > { %1303 = dma.done.wait (!%p932_p3), %s628_s21, 2048  }
 0x21c   : > { %1305 = vsyncadd (!%p932_p3), %s628_s21, 4294965248  ;;  %s22_s30 = sadd.s32 1, %s1380_s30   ;;  %s2050_s5 = sld [smem:[#allocation15_spill]] }
 0x21d   : > { %p1899_p5 = scmp.ge.s32.totalorder %s22_s30, 26   ;;  %s2051_s10 = smov %s1708_s12 }
 0x21e   : > { %s2052_s18 = sld [smem:[#allocation18_spill]]  ;;  %s2053_s19 = sld [smem:[#allocation19_spill]] }
 0x21f   : > { %s2054_s20 = sld [smem:[#allocation25_spill]]  ;;  %s2055_s26 = smov %s1632_s13 }
 0x220   : > { %s2056_s2 = sld [smem:[#allocation23_spill]]  ;;  %s2058_s6 = sld [smem:[#allocation24_spill]] }
 0x221   : > { %s2059_s13 = smov %s1316_s14  ;;  %s2060_s9 = smov %s2081_s24 }
 0x222   : > { %s2057_s12 = smov %s2050_s5  ;;  %s2061_s14 = smov %s1635_s1 }
 0x223   : > { %s2062_s15 = smov %s1324_s16  ;;  %s2063_s16 = smov %s1328_s17 }
 0x224   : > { %s2064_s17 = smov %s2051_s10  ;;  %s2065_s21 = smov %s1348_s22 }
 0x225   : > { %s2066_s22 = smov %s1352_s23  ;;  %s2067_s23 = smov %s2055_s26 }
 0x226   : > { %s2068_s24 = smov %s1368_s27  ;;  %s2069_s25 = smov %s1372_s28 }
 0x227   : > { %s2070_s26 = smov %s1376_s29  ;;  %s2071_s27 = smov %s2056_s2 }
 0x228   : > { %s2072_s28 = smov %s2058_s6  ;;  %s2073_s29 = smov %s2060_s9 }
 0x229   :  { %21 = sbr.rel (!%p1899_p5) target bundleno = 20 (0x14), region = 109 }
 0x230   :  { %633 = vsyncpa [#allocation4], 1 }
 0x231   :  { %635 = vsyncpa [#allocation4 + $0x1], 1 }
 0x232   :  { %636 = vsyncpa [#allocation7], 1 }
 0x233   :  { %638 = vsyncpa [#allocation7 + $0x1], 1 }
 0x234   :  { %639 = vsyncpa [#allocation5], 1 }
 0x235   :  { %641 = vsyncpa [#allocation5 + $0x1], 1 }

</bundles_post_ra>
